<compile_context>
chip_gen: v7x
topology: tpu7x:2x2x1
jax: 0.10.0
libtpu: 0.0.40
codegen_flags: <defaults>
</compile_context>

<pallas_src>
import functools

import jax
import jax.numpy as jnp
from jax import lax
from jax.experimental import pallas as pl
from jax.experimental.pallas import tpu as pltpu


def _conv_s2d_kernel(x_ref, w_ref, b_ref, o_ref, *, W2, n_dh, n_dw, bt):
    # x_ref: (bt, 4*Cin, H2*W2)  space-to-depth, channel-first, spatially flat
    # w_ref: (Cout, n_taps*4*Cin) tap-stacked matmul weight (compute dtype)
    # b_ref: (Cout, 1) f32
    # o_ref: (bt, Cout, Ho*W2)   "wide" output; halo column sliced off outside
    _, Cout, M = o_ref.shape

    w = w_ref[...]
    # Hoisted single lane-broadcast of the bias (f32 accumulator init).
    bias = jnp.broadcast_to(b_ref[...], (Cout, M)).astype(jnp.float32)

    for b in range(bt):  # static unroll; bt is small
        # Stack the taps along the sublane axis: each tap is a contiguous
        # lane-window slice of the flattened image -> (n_taps*4*Cin, M).
        parts = []
        for dH in range(n_dh):
            for dW in range(n_dw):
                off = dH * W2 + dW  # static
                parts.append(x_ref[b, :, pl.ds(off, M)])
        patch = jnp.concatenate(parts, axis=0)
        # One MXU matmul per image, f32 accumulation, bias folded in.
        acc = jnp.dot(w, patch, preferred_element_type=jnp.float32) + bias
        o_ref[b] = acc.astype(o_ref.dtype)


def _pick_batch_tile(n, m, img_bytes):
    """Images per grid step: pack when the per-image lane extent is small."""
    if m >= 128:
        return 1
    want = pl.cdiv(128, m)          # reach ~a full vreg of lanes per step
    bt = 1
    for d in range(1, n + 1):
        if n % d == 0 and d <= want and d * img_bytes <= (2 << 20):
            bt = d
    return bt


def conv_downsample_pallas(x_nchw, weight, bias, *, padding=1,
                           compute_dtype=jnp.bfloat16):
    """Equivalent of ConvolutionalDownsampleLayer.forward (conv stride is 2).

    x_nchw: (N, Cin, H, W)
    weight: (Cout, Cin, KH, KW)  (PyTorch OIHW conv weight layout)
    bias:   (Cout,)
    returns (N, Cout, Ho, Wo) NCHW, Ho = (H + 2p - KH)//2 + 1, etc.
    """
    N, Cin, H, W = x_nchw.shape
    Cout, _, KH, KW = weight.shape
    stride = 2  # hardcoded in the module's Conv2d
    Ho = (H + 2 * padding - KH) // stride + 1
    Wo = (W + 2 * padding - KW) // stride + 1

    # Space-to-depth geometry: 2x2 blocks; taps over block offsets (dH, dW).
    n_dh = (KH + 1) // 2
    n_dw = (KW + 1) // 2
    n_taps = n_dh * n_dw
    H2 = Ho + n_dh          # +slack rows so every tap slice stays in-bounds
    W2 = Wo + n_dw - 1      # halo column(s); sliced off after the kernel
    Hp, Wp = 2 * H2, 2 * W2
    rp_h = Hp - H - padding
    rp_w = Wp - W - padding
    assert rp_h >= 0 and rp_w >= 0
    C16 = 4 * Cin
    K = n_taps * C16
    M = Ho * W2

    # --- Single wrapper relayout: pad + space-to-depth, channel first,
    # flattened spatial (lane-dense), cast to the compute dtype.  Zero padding
    # beyond the conv's own `padding` is only read for discarded halo
    # positions or multiplied by the zero-padded weight taps.
    x_pad = jnp.pad(
        x_nchw, ((0, 0), (0, 0), (padding, rp_h), (padding, rp_w)))
    x_s2d = x_pad.reshape(N, Cin, H2, 2, W2, 2).transpose(0, 3, 5, 1, 2, 4)
    x_flat = x_s2d.reshape(N, C16, H2 * W2).astype(compute_dtype)

    # --- Tap-stacked weight (Cout, n_taps*4*Cin), matching the s2d channel
    # ordering (k = dh*2*Cin + dw*Cin + c) and the in-kernel tap concat order.
    w_p = jnp.pad(
        weight, ((0, 0), (0, 0), (0, 2 * n_dh - KH), (0, 2 * n_dw - KW)))
    w_cat = (w_p.reshape(Cout, Cin, n_dh, 2, n_dw, 2)
             .transpose(2, 4, 0, 3, 5, 1)          # (dH, dW, Cout, dh, dw, c)
             .reshape(n_taps, Cout, C16)
             .transpose(1, 0, 2)                   # (Cout, tap, 4*Cin)
             .reshape(Cout, K)
             .astype(compute_dtype))
    b2d = bias.reshape(Cout, 1).astype(jnp.float32)

    img_bytes = int(C16 * H2 * W2 * jnp.dtype(compute_dtype).itemsize)
    bt = _pick_batch_tile(N, M, img_bytes)
    kernel = functools.partial(
        _conv_s2d_kernel, W2=W2, n_dh=n_dh, n_dw=n_dw, bt=bt)

    out_wide = pl.pallas_call(
        kernel,
        out_shape=jax.ShapeDtypeStruct((N, Cout, M), x_nchw.dtype),
        grid_spec=pltpu.PrefetchScalarGridSpec(
            num_scalar_prefetch=0,
            grid=(N // bt,),
            in_specs=[
                pl.BlockSpec((bt, C16, H2 * W2), lambda n: (n, 0, 0)),
                pl.BlockSpec((Cout, K), lambda n: (0, 0)),
                pl.BlockSpec((Cout, 1), lambda n: (0, 0)),
            ],
            out_specs=pl.BlockSpec((bt, Cout, M), lambda n: (n, 0, 0)),
        ),
        compiler_params=pltpu.CompilerParams(
            dimension_semantics=("parallel",),
            vmem_limit_bytes=32 * 1024 * 1024),
    )(x_flat, w_cat, b2d)

    # Already NCHW: free reshape + thin slice dropping the halo column.
    return out_wide.reshape(N, Cout, Ho, W2)[:, :, :, :Wo]


def _reference_conv(x_nchw, weight, bias, *, stride=2, padding=1):
    out = lax.conv_general_dilated(
        x_nchw, weight,
        window_strides=(stride, stride),
        padding=((padding, padding), (padding, padding)),
        dimension_numbers=("NCHW", "OIHW", "NCHW"),
        precision=lax.Precision.HIGHEST,
    )
    return out + bias.reshape(1, -1, 1, 1)


if __name__ == "__main__":
    key = jax.random.PRNGKey(0)
    k_x, k_w, k_b = jax.random.split(key, 3)

    # Module config: in_channels=4, out_channels=8, kernel=3, stride=2, pad=1.
    N, Cin, H, W = 2, 4, 16, 16
    Cout, KH, KW = 8, 3, 3

    x = jax.random.normal(k_x, (N, Cin, H, W), dtype=jnp.float32)
    fan_in = Cin * KH * KW
    bound = 1.0 / (fan_in ** 0.5)
    weight = jax.random.uniform(
        k_w, (Cout, Cin, KH, KW), minval=-bound, maxval=bound,
        dtype=jnp.float32)
    bias = jax.random.uniform(
        k_b, (Cout,), minval=-bound, maxval=bound, dtype=jnp.float32)

    out = conv_downsample_pallas(x, weight, bias, padding=1)
    out = jax.block_until_ready(out)

    ref = _reference_conv(x, weight, bias, stride=2, padding=1)
    assert out.shape == (N, Cout, H // 2, W // 2), out.shape
    # bf16 operands (f32 accumulation) -> widened tolerance vs f32 reference.
    assert jnp.allclose(out, ref, rtol=5e-2, atol=5e-2), "mismatch vs XLA conv"

    print("KERNEL_OK")
</pallas_src>

<mosaic_0001>
module attributes {stable_mosaic.version = 11 : i64} {
  func.func @_conv_s2d_kernel(%arg0: i32, %arg1: memref<2x16x90xbf16, #tpu.memory_space<vmem>>, %arg2: memref<8x64xbf16, #tpu.memory_space<vmem>>, %arg3: memref<8x1xf32, #tpu.memory_space<vmem>>, %arg4: memref<2x8x72xf32, #tpu.memory_space<vmem>>) attributes {dimension_semantics = [#tpu.dimension_semantics<parallel>], iteration_bounds = array<i64: 1>, scalar_prefetch = 0 : i64, scratch_operands = 0 : i64, tpu.core_type = #tpu.core_type<tc>, window_params = [{transform_indices = @transform_0, window_bounds = array<i64: 2, 16, 90>}, {pipeline_mode = #tpu.pipeline_mode<synchronous>, transform_indices = @transform_1, window_bounds = array<i64: 8, 64>}, {pipeline_mode = #tpu.pipeline_mode<synchronous>, transform_indices = @transform_2, window_bounds = array<i64: 8, 1>}, {transform_indices = @transform_3, window_bounds = array<i64: 2, 8, 72>}]} {
    %c0 = arith.constant 0 : index
    %c0_0 = arith.constant 0 : index
    %0 = vector.load %arg2[%c0, %c0_0] : memref<8x64xbf16, #tpu.memory_space<vmem>>, vector<8x64xbf16>
    %c0_1 = arith.constant 0 : index
    %c0_2 = arith.constant 0 : index
    %1 = vector.load %arg3[%c0_1, %c0_2] : memref<8x1xf32, #tpu.memory_space<vmem>>, vector<8x1xf32>
    %2 = vector.shape_cast %1 : vector<8x1xf32> to vector<8x1xf32>
    %3 = vector.broadcast %2 : vector<8x1xf32> to vector<8x72xf32>
    %c0_3 = arith.constant 0 : index
    %c0_4 = arith.constant 0 : index
    %c0_5 = arith.constant 0 : index
    %4 = vector.load %arg1[%c0_3, %c0_4, %c0_5] : memref<2x16x90xbf16, #tpu.memory_space<vmem>>, vector<1x16x72xbf16>
    %5 = vector.shape_cast %4 : vector<1x16x72xbf16> to vector<16x72xbf16>
    %c0_6 = arith.constant 0 : index
    %c0_7 = arith.constant 0 : index
    %c1 = arith.constant 1 : index
    %6 = vector.load %arg1[%c0_6, %c0_7, %c1] : memref<2x16x90xbf16, #tpu.memory_space<vmem>>, vector<1x16x72xbf16>
    %7 = vector.shape_cast %6 : vector<1x16x72xbf16> to vector<16x72xbf16>
    %c0_8 = arith.constant 0 : index
    %c0_9 = arith.constant 0 : index
    %c9 = arith.constant 9 : index
    %8 = vector.load %arg1[%c0_8, %c0_9, %c9] : memref<2x16x90xbf16, #tpu.memory_space<vmem>>, vector<1x16x72xbf16>
    %9 = vector.shape_cast %8 : vector<1x16x72xbf16> to vector<16x72xbf16>
    %c0_10 = arith.constant 0 : index
    %c0_11 = arith.constant 0 : index
    %c10 = arith.constant 10 : index
    %10 = vector.load %arg1[%c0_10, %c0_11, %c10] : memref<2x16x90xbf16, #tpu.memory_space<vmem>>, vector<1x16x72xbf16>
    %11 = vector.shape_cast %10 : vector<1x16x72xbf16> to vector<16x72xbf16>
    %12 = tpu.concatenate %5, %7, %9, %11 in 0 : vector<16x72xbf16>, vector<16x72xbf16>, vector<16x72xbf16>, vector<16x72xbf16> -> vector<64x72xbf16>
    %cst = arith.constant dense<0.000000e+00> : vector<8x72xf32>
    %13 = tpu.matmul %0, %12, %cst {dimension_numbers = #tpu.dot_dimension_numbers<[1], [0], [0], [1], [0, 0, 1, 1], [], []>} : vector<8x64xbf16>, vector<64x72xbf16>, vector<8x72xf32> -> vector<8x72xf32>
    %14 = arith.addf %13, %3 : vector<8x72xf32>
    %c0_12 = arith.constant 0 : index
    %c0_13 = arith.constant 0 : index
    %c0_14 = arith.constant 0 : index
    %15 = vector.load %arg4[%c0_12, %c0_13, %c0_14] : memref<2x8x72xf32, #tpu.memory_space<vmem>>, vector<1x8x72xf32>
    %16 = vector.shape_cast %15 : vector<1x8x72xf32> to vector<8x72xf32>
    %17 = vector.shape_cast %14 : vector<8x72xf32> to vector<1x8x72xf32>
    tpu.vector_store %arg4[%c0_12, %c0_13, %c0_14], %17 {strides = array<i32>} : memref<2x8x72xf32, #tpu.memory_space<vmem>>, vector<1x8x72xf32>,
    %c1_15 = arith.constant 1 : index
    %c0_16 = arith.constant 0 : index
    %c0_17 = arith.constant 0 : index
    %18 = vector.load %arg1[%c1_15, %c0_16, %c0_17] : memref<2x16x90xbf16, #tpu.memory_space<vmem>>, vector<1x16x72xbf16>
    %19 = vector.shape_cast %18 : vector<1x16x72xbf16> to vector<16x72xbf16>
    %c1_18 = arith.constant 1 : index
    %c0_19 = arith.constant 0 : index
    %c1_20 = arith.constant 1 : index
    %20 = vector.load %arg1[%c1_18, %c0_19, %c1_20] : memref<2x16x90xbf16, #tpu.memory_space<vmem>>, vector<1x16x72xbf16>
    %21 = vector.shape_cast %20 : vector<1x16x72xbf16> to vector<16x72xbf16>
    %c1_21 = arith.constant 1 : index
    %c0_22 = arith.constant 0 : index
    %c9_23 = arith.constant 9 : index
    %22 = vector.load %arg1[%c1_21, %c0_22, %c9_23] : memref<2x16x90xbf16, #tpu.memory_space<vmem>>, vector<1x16x72xbf16>
    %23 = vector.shape_cast %22 : vector<1x16x72xbf16> to vector<16x72xbf16>
    %c1_24 = arith.constant 1 : index
    %c0_25 = arith.constant 0 : index
    %c10_26 = arith.constant 10 : index
    %24 = vector.load %arg1[%c1_24, %c0_25, %c10_26] : memref<2x16x90xbf16, #tpu.memory_space<vmem>>, vector<1x16x72xbf16>
    %25 = vector.shape_cast %24 : vector<1x16x72xbf16> to vector<16x72xbf16>
    %26 = tpu.concatenate %19, %21, %23, %25 in 0 : vector<16x72xbf16>, vector<16x72xbf16>, vector<16x72xbf16>, vector<16x72xbf16> -> vector<64x72xbf16>
    %cst_27 = arith.constant dense<0.000000e+00> : vector<8x72xf32>
    %27 = tpu.matmul %0, %26, %cst_27 {dimension_numbers = #tpu.dot_dimension_numbers<[1], [0], [0], [1], [0, 0, 1, 1], [], []>} : vector<8x64xbf16>, vector<64x72xbf16>, vector<8x72xf32> -> vector<8x72xf32>
    %28 = arith.addf %27, %3 : vector<8x72xf32>
    %c1_28 = arith.constant 1 : index
    %c0_29 = arith.constant 0 : index
    %c0_30 = arith.constant 0 : index
    %29 = vector.load %arg4[%c1_28, %c0_29, %c0_30] : memref<2x8x72xf32, #tpu.memory_space<vmem>>, vector<1x8x72xf32>
    %30 = vector.shape_cast %29 : vector<1x8x72xf32> to vector<8x72xf32>
    %31 = vector.shape_cast %28 : vector<8x72xf32> to vector<1x8x72xf32>
    tpu.vector_store %arg4[%c1_28, %c0_29, %c0_30], %31 {strides = array<i32>} : memref<2x8x72xf32, #tpu.memory_space<vmem>>, vector<1x8x72xf32>,
    return
  }
  func.func @transform_0(%arg0: i32) -> (i32, i32, i32) {
    %c0_i32 = arith.constant 0 : i32
    %c0_i32_0 = arith.constant 0 : i32
    %c0_i32_1 = arith.constant 0 : i32
    return %arg0, %c0_i32, %c0_i32_0 : i32, i32, i32
  }
  func.func @transform_1(%arg0: i32) -> (i32, i32) {
    %c0_i32 = arith.constant 0 : i32
    %c0_i32_0 = arith.constant 0 : i32
    %c0_i32_1 = arith.constant 0 : i32
    return %c0_i32, %c0_i32_0 : i32, i32
  }
  func.func @transform_2(%arg0: i32) -> (i32, i32) {
    %c0_i32 = arith.constant 0 : i32
    %c0_i32_0 = arith.constant 0 : i32
    %c0_i32_1 = arith.constant 0 : i32
    return %c0_i32, %c0_i32_0 : i32, i32
  }
  func.func @transform_3(%arg0: i32) -> (i32, i32, i32) {
    %c0_i32 = arith.constant 0 : i32
    %c0_i32_0 = arith.constant 0 : i32
    %c0_i32_1 = arith.constant 0 : i32
    return %arg0, %c0_i32, %c0_i32_0 : i32, i32, i32
  }
}

</mosaic_0001>

<bundles_post_ra>
// kernel: tpu_custom_call.1
= control target key start
LH: loop header
LB: loop body
LE: loop exit
PB: predicated region body
PF: predicated region fallthrough
CT: control target
= control target key end

     0   :  { %8 = vsyncpa [#allocation3], 0  ;;  %s340_s0 = inlined_call_operand.hbm [shape: bf16[2,16,90], index: 0, kind: input, shape index: {}]   ;;  %s341_s1 = inlined_call_operand.vmem [shape: bf16[8,64], index: 1, kind: input, shape index: {}]   ;;  %s342_s2 = inlined_call_operand.vmem [shape: f32[8,1], index: 2, kind: input, shape index: {}]   ;;  %s343_s3 = inlined_call_operand.hbm [shape: f32[2,8,72], index: 3, kind: output, shape index: {}]  }
   0x1   :  { %9 = vsyncpa [#allocation4], 0  ;;  %s278_s12 = smov [#allocation2]   ;;  %s230_s16 = scalar_lea.hbm %s340_s0, 256 }
   0x2   :  { %s15_s13 = sshll.u32 %s278_s12, 4  ;;  %p231_p0 = scmp.ne.s32.totalorder %s340_s0, %s230_s16  ;;  %s16_s13 = int_to_ptr.vmem [resolvable:$true] %s15_s13 }
   0x3   :  { %p234_p1 = scmp.lt.u32.totalorder %s230_s16, %s340_s0 }
   0x5   :  { %p236_p2 = pnand %p234_p1, %p231_p0 }
   0x7   :  { %239 = shalt.err (!%p236_p2)
}
   0x8   :  { %s240_s21 = scalar_lea.vmem %s16_s13, 256  ;;  %p245_p4 = scmp.lt.s32.totalorder %s16_s13, %s16_s13 }
   0x9   :  { %p241_p3 = scmp.ne.s32.totalorder %s16_s13, %s240_s21  ;;  %p246_p5 = scmp.lt.s32.totalorder %s240_s21, %s240_s21 }
   0xb   :  { %p247_p6 = por %p246_p5, %p245_p4 }
   0xd   :  { %p248_p7 = pnand %p247_p6, %p241_p3 }
   0xf   :  { %251 = shalt.err (!%p248_p7)
}
  0x10   :  { %s279_s22 = smov 64   ;;  %s280_s23 = smov 4  }
  0x11   :  { %21 = dma.hbm_to_vmem [thread:$0]  %s340_s0, 256, %s16_s13, [#allocation3], %s279_s22, %s279_s22, %s280_s23  }
  0x12   :  { %274 = dma.done.wait [#allocation3], 256  }
  0x13   :  { %275 = vsyncadd [#allocation3], 4294967040  ;;  %v281_v0 = vmov 0.0   ;;  %vm282_vm0 = vmmov 0   ;;  %v228_v1 = vld [vmem:[#allocation2] sm:$0xff]   ;;  %v229_v2 = vld [vmem:[#allocation2 + $0x8] sm:$0xff]  }
  0x14   :  { %191 = vmatprep.subr.bf16.mxu0 %v281_v0  ;;  %203 = vmatprep.subr.bf16.mxu1 %v281_v0  ;;  %s283_s26 = smov 127   ;;  %s284_s27 = smov 119   ;;  %v285_v3 = vmov 0   ;;  %v31_v4 = vld [vmem:[%s342_s2] sm:$0xff]  ;;  %vm54_vm1 = vcmask 523264   ;;  %vm98_vm2 = vcmask 588800  }
  0x15   :  { %199 = vmatprep.mubr.msk.bf16.mxu0 %vm282_vm0, %v281_v0  ;;  %211 = vmatprep.mubr.msk.bf16.mxu1 %vm282_vm0, %v281_v0  ;;  %s286_s0 = smov 118   ;;  %v30_v10 = vld [vmem:[%s341_s1] sm:$0xf]  ;;  %s287_s2 = smov [#allocation5]  }
  0x16   :  { %45 = vrot.lane.b32.xlu0 %v228_v1, %s283_s26  ;;  %48 = vrot.lane.b32.xlu1 %v228_v1, %s284_s27  ;;  %s165_s5 = sshll.u32 %s287_s2, 4  ;;  %s166_s5 = int_to_ptr.vmem [resolvable:$true] %s165_s5 }
  0x17   :  { %192 = vmatpush3.bf16.msra.mxu0 %v228_v1  ;;  %204 = vmatpush3.bf16.msra.mxu1 %v229_v2  ;;  %s252_s1 = scalar_lea.vmem %s166_s5, 256  ;;  %p257_p9 = scmp.lt.s32.totalorder %s166_s5, %s166_s5 }
  0x18   :  { %193 = vmatprep.subr.bf16.mxu0 %v281_v0  ;;  %205 = vmatprep.subr.bf16.mxu1 %v281_v0  ;;  %p253_p8 = scmp.ne.s32.totalorder %s166_s5, %s252_s1  ;;  %p258_p10 = scmp.lt.s32.totalorder %s252_s1, %s252_s1 }
  0x19   :  { %227 = vset.pattern.permute.xlu0 %v285_v3 }
  0x1a   :  { %109 = vrot.lane.b32.xlu0 %v229_v2, %s283_s26  ;;  %112 = vrot.lane.b32.xlu1 %v229_v2, %s284_s27  ;;  %p259_p11 = por %p258_p10, %p257_p9 }
  0x1c   :  { %p260_p12 = pnand %p259_p11, %p253_p8 }
  0x1e   :  { %51 = vrot.lane.b32.xlu0 %v228_v1, %s286_s0  ;;  %115 = vrot.lane.b32.xlu1 %v229_v2, %s286_s0 }
  0x22   :  { %34 = vperm.xlu0 %227, %v31_v4  }
  0x88   :  { %v46_v5 = vpop.permute.xlu0 %45  ;;  %v49_v6 = vpop.permute.xlu1 %48 }
  0x89   :  { %194 = vmatpush3.bf16.msra.mxu0 %v46_v5 }
  0x8a   :  { %195 = vmatprep.subr.bf16.mxu0 %v281_v0 }
  0x8c   :  { %v110_v7 = vpop.permute.xlu0 %109  ;;  %v113_v8 = vpop.permute.xlu1 %112 }
  0x8d   :  { %196 = vmatpush3.bf16.msra.mxu0 %v49_v6  ;;  %206 = vmatpush3.bf16.msra.mxu1 %v110_v7 }
  0x8e   :  { %207 = vmatprep.subr.bf16.mxu1 %v281_v0  ;;  %197 = vmatprep.subr.bf16.mxu0 %v281_v0 }
  0x90   :  { %v52_v9 = vpop.permute.xlu0 %51  ;;  %v116_v11 = vpop.permute.xlu1 %115 }
  0x91   :  { %208 = vmatpush3.bf16.msra.mxu1 %v113_v8  ;;  %198 = vmatpush3.bf16.msra.mxu0 %v52_v9 }
  0x92   :  { %209 = vmatprep.subr.bf16.mxu1 %v281_v0 }
  0x94   :  { %200 = vmatmul.mubr.msk.bf16.vlgmr.msra.gmra.mrb[0].mxu0 %vm54_vm1, %v30_v10 }
  0x95   :  { %210 = vmatpush3.bf16.msra.mxu1 %v116_v11 }
  0x98   :  { %212 = vmatmul.mubr.msk.bf16.vlgmr.msra.gmra.mrb[0].mxu1 %vm54_vm1, %v30_v10 }
  0xa1   :  { %v35_v12 = vpop.permute.xlu0 %34 }
 0x167   :  { %v92_v13 = vpop.f32.mrb[0].mxu0 }
 0x168   :  { %v201_v14 = vpop.f32.mrb[1].mxu0  ;;  %v93_v15 = vadd.f32 %v92_v13, %v35_v12 }
 0x169   :  { %v95_v16 = vpop.f32.mrb[2].mxu0 }
 0x16a   :  { %99 = vst.msk [vmem:[#allocation5] sm:$0xff] %vm98_vm2, %v93_v15  ;;  %v202_v17 = vpop.f32.mrb[3].mxu0 }
 0x16b   :  { %v152_v18 = vpop.f32.mrb[0].mxu1 }
 0x16c   :  { %v153_v19 = vadd.f32 %v152_v18, %v35_v12  ;;  %v213_v20 = vpop.f32.mrb[1].mxu1 }
 0x16d   :  { %v155_v21 = vpop.f32.mrb[2].mxu1 }
 0x16e   :  { %159 = vst.msk [vmem:[#allocation5 + $0x8] sm:$0xff] %vm98_vm2, %v153_v19  ;;  %v214_v22 = vpop.f32.mrb[3].mxu1 }
 0x16f   :  { %263 = shalt.err (!%p260_p12)
}
 0x170   :  { %s264_s8 = scalar_lea.hbm %s343_s3, 256 }
 0x171   :  { %p265_p13 = scmp.ne.s32.totalorder %s343_s3, %s264_s8  ;;  %p268_p0 = scmp.lt.u32.totalorder %s264_s8, %s343_s3 }
 0x173   :  { %p270_p1 = pnand %p268_p0, %p265_p13 }
 0x175   :  { %273 = shalt.err (!%p270_p1)
}
 0x176   :  { %s288_s13 = smov 128   ;;  %s289_s14 = smov 8  }
 0x177   :  { %171 = dma.vmem_to_hbm [thread:$0]  %s166_s5, 256, %s343_s3, [#allocation4], %s288_s13, %s288_s13, %s289_s14  }
 0x178   :  { %276 = dma.done.wait [#allocation4], 256  }
 0x179   :  { %277 = vsyncadd [#allocation4], 4294967040 }
 0x17a   :  { %175 = vsyncpa [#allocation3], 1 }
 0x17b   :  { %176 = vsyncpa [#allocation4], 1 }

</bundles_post_ra>
